<compile_context>
chip_gen: v7x
topology: tpu7x:2x2x1
jax: 0.10.0
libtpu: 0.0.40
codegen_flags: <defaults>
</compile_context>

<pallas_src>
import math
from functools import partial

import jax
import jax.numpy as jnp
from jax import lax
from jax.experimental import pallas as pl
from jax.experimental.pallas import tpu as pltpu

LN_EPS = 1e-5
HIGH = lax.Precision.HIGH
HIGHEST = lax.Precision.HIGHEST


def _dot(a, b, precision=None):
    """a @ b (2-D), f32 accumulation."""
    return lax.dot_general(a, b, (((1,), (0,)), ((), ())),
                           precision=precision,
                           preferred_element_type=jnp.float32)


def _dot_nt(a, b, precision=None):
    """a @ b.T (contract the last axis of both), f32 accumulation."""
    return lax.dot_general(a, b, (((1,), (1,)), ((), ())),
                           precision=precision,
                           preferred_element_type=jnp.float32)


def _softmax_lastdim(x):
    x_max = jnp.max(x, axis=-1, keepdims=True)
    e = jnp.exp(x - x_max)
    return e * pl.reciprocal(jnp.sum(e, axis=-1, keepdims=True), approx=True)


def _vmem_limit_bytes(requested):
    """Scoped-VMEM cap: raise the conservative default (v6e feedback) while
    staying below the physical per-core budget (v7x has 64 MiB per TC)."""
    try:
        phys = pltpu.get_tpu_info().vmem_capacity_bytes
    except Exception:
        phys = 64 * 1024 * 1024
    return int(min(requested, max(phys - 16 * 1024 * 1024, 32 * 1024 * 1024)))


# ---------------------------------------------------------------------------
# Kernel A: fused LayerNorm + Q/K/V projections, gridded over (b*n) row tiles.
# Weights are bf16 residents; q/k/v are emitted as bf16.
# ---------------------------------------------------------------------------
def _ln_qkv_kernel(x_ref, g_ref, b_ref, wq_ref, wk_ref, wv_ref,
                   q_ref, k_ref, v_ref):
    x = x_ref[...]                                            # (Tr, D) f32
    mu = jnp.mean(x, axis=-1, keepdims=True)
    var = jnp.mean((x - mu) ** 2, axis=-1, keepdims=True)
    xn = (x - mu) * lax.rsqrt(var + LN_EPS)
    xn = (xn * g_ref[...] + b_ref[...]).astype(jnp.bfloat16)  # LN affine
    q_ref[...] = _dot(xn, wq_ref[...]).astype(q_ref.dtype)    # bf16 MXU pass
    k_ref[...] = _dot(xn, wk_ref[...]).astype(k_ref.dtype)
    v_ref[...] = _dot(xn, wv_ref[...]).astype(v_ref.dtype)


def _ln_qkv(x2d, gamma, beta, wq, wk, wv, *, row_tile=512):
    rows, d = x2d.shape
    inner = wq.shape[1]
    tr = min(row_tile, rows)
    out_sds = jax.ShapeDtypeStruct((rows, inner), jnp.bfloat16)
    row_spec = pl.BlockSpec((tr, inner), lambda i: (i, 0))
    return pl.pallas_call(
        _ln_qkv_kernel,
        out_shape=(out_sds, out_sds, out_sds),
        grid=(pl.cdiv(rows, tr),),
        in_specs=[
            pl.BlockSpec((tr, d), lambda i: (i, 0)),
            pl.BlockSpec((1, d), lambda i: (0, 0)),           # gamma resident
            pl.BlockSpec((1, d), lambda i: (0, 0)),           # beta  resident
            pl.BlockSpec((d, inner), lambda i: (0, 0)),       # bf16 weights
            pl.BlockSpec((d, inner), lambda i: (0, 0)),
            pl.BlockSpec((d, inner), lambda i: (0, 0)),
        ],
        out_specs=(row_spec, row_spec, row_spec),
        compiler_params=pltpu.CompilerParams(
            dimension_semantics=("parallel",),
            vmem_limit_bytes=_vmem_limit_bytes(64 * 1024 * 1024)),
    )(x2d, gamma.reshape(1, d), beta.reshape(1, d), wq, wk, wv)


# ---------------------------------------------------------------------------
# Kernel B: Nystrom attention core, one batch element per grid step, all heads
# processed inside the step on the merged lane-dense layout.
# ---------------------------------------------------------------------------
def _nystrom_attn_kernel(wconv_ref, q_ref, k_ref, v_ref,
                         qland_ref, kland_ref, attn2_ref, z0_ref,
                         *out_and_scratch,
                         scale, heads, dh, m, n_pad, n_seq, ks, pad_conv,
                         pinv_iters, with_attn):
    if with_attn:
        out_ref, attn_ref, vpad_ref = out_and_scratch
    else:
        out_ref, vpad_ref = out_and_scratch
    f32 = jnp.float32
    inner = heads * dh
    pad_seq = n_pad - n_seq

    q = q_ref[0]                             # (Np, inner) bf16
    k = k_ref[0]
    v = v_ref[0]
    q_land = qland_ref[0]                    # (m, inner) bf16 (already *scale)
    k_land = kland_ref[0]

    # ---- depthwise residual conv along the sequence axis --------------------
    # Merged lane-dense layout: per tap a (1, inner) broadcast row where column
    # c carries w_conv[c // dh, tap].  Only the pad rows are zeroed.
    zeros_pad = jnp.zeros((pad_conv, inner), f32)
    vpad_ref[0:pad_conv, :] = zeros_pad
    vpad_ref[pad_conv + n_pad:, :] = zeros_pad
    vpad_ref[pad_conv:pad_conv + n_pad, :] = v.astype(f32)
    conv = jnp.zeros((n_pad, inner), f32)
    for kk in range(ks):
        conv = conv + wconv_ref[kk:kk + 1, :] * vpad_ref[kk:kk + n_pad, :]

    # ---- batched Moore-Penrose pseudo-inverse of attn2 (all heads at once) --
    # attn2 and z0 = attn2^T * (global pinv scale) arrive from the XLA prepass;
    # nothing is recomputed here.
    a2 = attn2_ref[0]                        # (heads, m, m) f32
    z = z0_ref[0]                            # (heads, m, m) f32
    ii = lax.broadcasted_iota(jnp.int32, (m, m), 0)
    jj = lax.broadcasted_iota(jnp.int32, (m, m), 1)
    eye = jnp.where(ii == jj, 1.0, 0.0).astype(f32)
    eye7, eye13, eye15 = 7.0 * eye, 13.0 * eye, 15.0 * eye

    def bmm(x_, y_):
        return jnp.einsum("hij,hjk->hik", x_, y_, precision=HIGH,
                          preferred_element_type=f32)

    for _ in range(pinv_iters):
        xz = bmm(a2, z)
        t = eye7 - xz
        t = eye15 - bmm(xz, t)
        t = eye13 - bmm(xz, t)
        z = 0.25 * bmm(z, t)

    # ---- per-head Nystrom aggregation ---------------------------------------
    outs = []
    for h in range(heads):
        sl = slice(h * dh, (h + 1) * dh)
        q_h, k_h, v_h = q[:, sl], k[:, sl], v[:, sl]
        ql_h, kl_h = q_land[:, sl], k_land[:, sl]

        attn1 = _softmax_lastdim(_dot_nt(q_h, kl_h) * scale)     # (Np, m)
        attn3 = _softmax_lastdim(_dot_nt(ql_h, k_h))             # (m, Np)

        a1z = _dot(attn1, z[h])                                  # (Np, m)
        a3v = _dot(attn3.astype(jnp.bfloat16), v_h)              # (m, dh)
        outs.append(_dot(a1z, a3v))                              # (Np, dh)
        if with_attn:
            # TODO(synk): for very long sequences the (Np, Np) attention block
            # should be tiled along the query axis (v7x 64 MiB/TC VMEM cliff).
            attn_ref[0, h] = _dot(a1z, attn3).astype(attn_ref.dtype)

    out = jnp.concatenate(outs, axis=-1) + conv                  # (Np, inner)
    out_ref[0] = out[pad_seq:, :]            # drop the front padding rows


def _nystrom_attention(q_p, k_p, v_p, q_land, k_land, attn2, z0,
                       w_conv_merged, *, scale, heads, dh, m, n_seq,
                       pinv_iters, ks, with_attn=True):
    b, n_pad, inner = q_p.shape
    pad_conv = ks // 2
    kern = partial(_nystrom_attn_kernel, scale=scale, heads=heads, dh=dh,
                   m=m, n_pad=n_pad, n_seq=n_seq, ks=ks, pad_conv=pad_conv,
                   pinv_iters=pinv_iters, with_attn=with_attn)

    out_shape = [jax.ShapeDtypeStruct((b, n_seq, inner), jnp.float32)]
    out_specs = [pl.BlockSpec((1, n_seq, inner), lambda i: (i, 0, 0))]
    if with_attn:
        out_shape.append(
            jax.ShapeDtypeStruct((b, heads, n_pad, n_pad), jnp.bfloat16))
        out_specs.append(
            pl.BlockSpec((1, heads, n_pad, n_pad), lambda i: (i, 0, 0, 0)))

    res = pl.pallas_call(
        kern,
        out_shape=tuple(out_shape),
        grid=(b,),                                   # keep b even on v7x
        in_specs=[
            pl.BlockSpec((ks, inner), lambda i: (0, 0)),            # conv taps
            pl.BlockSpec((1, n_pad, inner), lambda i: (i, 0, 0)),   # q (bf16)
            pl.BlockSpec((1, n_pad, inner), lambda i: (i, 0, 0)),   # k (bf16)
            pl.BlockSpec((1, n_pad, inner), lambda i: (i, 0, 0)),   # v (bf16)
            pl.BlockSpec((1, m, inner), lambda i: (i, 0, 0)),       # q landmarks
            pl.BlockSpec((1, m, inner), lambda i: (i, 0, 0)),       # k landmarks
            pl.BlockSpec((1, heads, m, m), lambda i: (i, 0, 0, 0)), # attn2
            pl.BlockSpec((1, heads, m, m), lambda i: (i, 0, 0, 0)), # z0
        ],
        out_specs=tuple(out_specs),
        scratch_shapes=[pltpu.VMEM((n_pad + 2 * pad_conv, inner), jnp.float32)],
        compiler_params=pltpu.CompilerParams(
            dimension_semantics=("parallel",),
            vmem_limit_bytes=_vmem_limit_bytes(100 * 1024 * 1024)),
    )(w_conv_merged, q_p, k_p, v_p, q_land, k_land, attn2, z0)

    if with_attn:
        return res[0], res[1]
    return res[0], None


# ---------------------------------------------------------------------------
# Kernel C: output projection (+ bias) and residual add, over row tiles.
# ---------------------------------------------------------------------------
def _out_proj_kernel(y_ref, w_ref, b_ref, x_ref, xnew_ref, out_ref):
    y = y_ref[...].astype(jnp.bfloat16)
    o = _dot(y, w_ref[...]) + b_ref[...]
    out_ref[...] = o
    xnew_ref[...] = x_ref[...] + o


def _out_proj_residual(y2d, w_out, b_out, x2d, *, row_tile=512):
    rows, inner = y2d.shape
    d = w_out.shape[1]
    tr = min(row_tile, rows)
    return pl.pallas_call(
        _out_proj_kernel,
        out_shape=(jax.ShapeDtypeStruct((rows, d), jnp.float32),
                   jax.ShapeDtypeStruct((rows, d), jnp.float32)),
        grid=(pl.cdiv(rows, tr),),
        in_specs=[
            pl.BlockSpec((tr, inner), lambda i: (i, 0)),
            pl.BlockSpec((inner, d), lambda i: (0, 0)),       # bf16 weights
            pl.BlockSpec((1, d), lambda i: (0, 0)),
            pl.BlockSpec((tr, d), lambda i: (i, 0)),
        ],
        out_specs=(pl.BlockSpec((tr, d), lambda i: (i, 0)),
                   pl.BlockSpec((tr, d), lambda i: (i, 0))),
        compiler_params=pltpu.CompilerParams(
            dimension_semantics=("parallel",),
            vmem_limit_bytes=_vmem_limit_bytes(64 * 1024 * 1024)),
    )(y2d, w_out, b_out.reshape(1, d), x2d)


# ---------------------------------------------------------------------------
# Full forward = Nystrom_MSA.forward (eval mode): returns (x + out, out, attn)
# ---------------------------------------------------------------------------
def nystrom_msa_forward(x, params, return_attn=True):
    b, n, dim = x.shape
    heads = params["heads"]
    dh = params["dim_head"]
    inner = heads * dh
    m = params["num_landmarks"]
    iters = params["pinv_iterations"]
    ks = params["residual_conv_kernel"]
    scale = dh ** -0.5

    # Pre-split / pre-cast weights (in production these would be stored bf16).
    wq = params["w_qkv"][:, 0 * inner:1 * inner].astype(jnp.bfloat16)
    wk = params["w_qkv"][:, 1 * inner:2 * inner].astype(jnp.bfloat16)
    wv = params["w_qkv"][:, 2 * inner:3 * inner].astype(jnp.bfloat16)

    # 1) Kernel A: fused LayerNorm + QKV projection (bf16 q/k/v).
    q2d, k2d, v2d = _ln_qkv(x.reshape(b * n, dim), params["ln_gamma"],
                            params["ln_beta"], wq, wk, wv)

    # 2) Front-pad so the sequence divides into m landmark groups (to_qkv has
    #    no bias -> zero-padding the projection == padding the normed input).
    l = -(-n // m)                    # ceil(n / m)
    n_pad = m * l
    pad_seq = n_pad - n

    def pad_front(t):
        t = t.reshape(b, n, inner)
        if pad_seq > 0:
            t = jnp.pad(t, ((0, 0), (pad_seq, 0), (0, 0)))
        return t

    q_p, k_p, v_p = pad_front(q2d), pad_front(k2d), pad_front(v2d)

    # 3) Tiny XLA prepass feeding Kernel B (nothing here is recomputed in the
    #    kernel): landmark means, per-head (m, m) landmark attention and the
    #    global Moore-Penrose init z0 = attn2^T / (max_col_sum * max_row_sum).
    q_land = (q_p.astype(jnp.float32).reshape(b, m, l, inner).mean(axis=2)
              * scale)
    k_land = k_p.astype(jnp.float32).reshape(b, m, l, inner).mean(axis=2)
    sim2 = jnp.einsum("bihd,bjhd->bhij",
                      q_land.reshape(b, m, heads, dh),
                      k_land.reshape(b, m, heads, dh),
                      precision=HIGHEST)
    attn2 = jax.nn.softmax(sim2, axis=-1)
    denom = (jnp.max(jnp.sum(jnp.abs(attn2), -1)) *
             jnp.max(jnp.sum(jnp.abs(attn2), -2)))
    z0 = jnp.swapaxes(attn2, -1, -2) / denom

    # Merged-lane conv taps: column c = h*dh + d uses head h's tap value.
    w_conv_merged = jnp.repeat(params["w_conv"].T, dh, axis=1).astype(jnp.float32)

    # 4) Kernel B: per-batch Nystrom attention core (merged-head layout).
    out_m, attn = _nystrom_attention(
        q_p, k_p, v_p,
        q_land.astype(jnp.bfloat16), k_land.astype(jnp.bfloat16),
        attn2, z0, w_conv_merged,
        scale=scale, heads=heads, dh=dh, m=m, n_seq=n,
        pinv_iters=iters, ks=ks, with_attn=return_attn)

    # 5) Kernel C: output projection + residual add (dropout = identity, eval).
    x_new, out = _out_proj_residual(out_m.reshape(b * n, inner),
                                    params["w_out"].astype(jnp.bfloat16),
                                    params["b_out"], x.reshape(b * n, dim))
    return (x_new.reshape(b, n, dim), out.reshape(b, n, dim), attn)


# ---------------------------------------------------------------------------
# Deterministic parameter init (shapes follow the module's __init__).
# ---------------------------------------------------------------------------
def init_params(key, dim, heads):
    dh = dim // heads
    inner = heads * dh
    ks = 33                                                  # residual_conv_kernel
    k1, k2, k3, k4, k5, k6 = jax.random.split(key, 6)
    return {
        "heads": heads,
        "dim_head": dh,
        "num_landmarks": dim // 2,
        "pinv_iterations": 6,
        "residual_conv_kernel": ks,
        "ln_gamma": 1.0 + 0.1 * jax.random.normal(k1, (dim,), jnp.float32),
        "ln_beta": 0.1 * jax.random.normal(k2, (dim,), jnp.float32),
        "w_qkv": jax.random.normal(k3, (dim, 3 * inner), jnp.float32) / math.sqrt(dim),
        "w_out": jax.random.normal(k4, (inner, dim), jnp.float32) / math.sqrt(inner),
        "b_out": 0.02 * jax.random.normal(k5, (dim,), jnp.float32),
        "w_conv": 0.1 * jax.random.normal(k6, (heads, ks), jnp.float32),
    }


# ---------------------------------------------------------------------------
# Pure-JAX reference (mirrors lucidrains NystromAttention, eval mode).
# Computed at "highest" matmul precision as the ground truth; the kernels use
# bf16 boundaries and single-pass bf16 MXU matmuls with f32 accumulation.
# ---------------------------------------------------------------------------
def reference_forward(x, p):
    b, n, dim = x.shape
    h, dh = p["heads"], p["dim_head"]
    m, iters = p["num_landmarks"], p["pinv_iterations"]
    ks = p["residual_conv_kernel"]
    padc = ks // 2
    scale = dh ** -0.5

    with jax.default_matmul_precision("highest"):
        mu = x.mean(-1, keepdims=True)
        var = ((x - mu) ** 2).mean(-1, keepdims=True)
        xn = (x - mu) / jnp.sqrt(var + LN_EPS) * p["ln_gamma"] + p["ln_beta"]

        l = -(-n // m)
        n_pad = m * l
        pad = n_pad - n
        xp = jnp.pad(xn, ((0, 0), (pad, 0), (0, 0)))
        qkv = xp @ p["w_qkv"]
        q, k, v = jnp.split(qkv, 3, axis=-1)
        rs = lambda t: t.reshape(b, n_pad, h, dh).transpose(0, 2, 1, 3)
        q, k, v = rs(q), rs(k), rs(v)
        q = q * scale
        ql = q.reshape(b, h, m, l, dh).mean(axis=3)
        kl = k.reshape(b, h, m, l, dh).mean(axis=3)
        sim1 = jnp.einsum("bhnd,bhmd->bhnm", q, kl)
        sim2 = jnp.einsum("bhid,bhjd->bhij", ql, kl)
        sim3 = jnp.einsum("bhmd,bhnd->bhmn", ql, k)
        a1, a2, a3 = (jax.nn.softmax(s, -1) for s in (sim1, sim2, sim3))
        z = jnp.swapaxes(a2, -1, -2) / (
            jnp.max(jnp.sum(jnp.abs(a2), -1)) * jnp.max(jnp.sum(jnp.abs(a2), -2)))
        eye = jnp.eye(m, dtype=jnp.float32)
        for _ in range(iters):
            xz = a2 @ z
            z = 0.25 * z @ (13 * eye - xz @ (15 * eye - xz @ (7 * eye - xz)))
        out = (a1 @ z) @ (a3 @ v)
        vpad = jnp.pad(v, ((0, 0), (0, 0), (padc, padc), (0, 0)))
        conv = jnp.zeros_like(v)
        for kk in range(ks):
            conv = conv + p["w_conv"][None, :, kk, None, None] * vpad[:, :, kk:kk + n_pad, :]
        out = out + conv
        outm = out.transpose(0, 2, 1, 3).reshape(b, n_pad, h * dh)
        outp = (outm @ p["w_out"] + p["b_out"])[:, -n:]
        attn = (a1 @ z) @ a3
        return x + outp, outp, attn


if __name__ == "__main__":
    dim, heads = 64, 8            # dim_head=8, landmarks=32 (module: dim//8, dim//2)
    b, n = 2, 48                  # n % landmarks != 0 -> exercises front padding
    key = jax.random.PRNGKey(0)
    kp, kx = jax.random.split(key)
    params = init_params(kp, dim, heads)
    x = jax.random.normal(kx, (b, n, dim), jnp.float32)

    x_new, out, attn = nystrom_msa_forward(x, params)
    x_new, out, attn = jax.block_until_ready((x_new, out, attn))

    ref_x, ref_out, ref_attn = reference_forward(x, params)

    def _check(name, got, ref):
        err = float(jnp.max(jnp.abs(got.astype(jnp.float32) - ref)))
        # Tolerance sized for intentional bf16 I/O + single-pass bf16 MXU
        # matmuls in the kernels vs. a "highest"-precision f32 reference.
        tol = 3e-2 * (1.0 + float(jnp.max(jnp.abs(ref))))
        if not (err <= tol):
            raise AssertionError(f"{name}: max abs err {err} > tol {tol}")

    _check("x", x_new, ref_x)
    _check("out", out, ref_out)
    _check("attn", attn, ref_attn)
    print("KERNEL_OK")
</pallas_src>

<mosaic_0001>
module attributes {stable_mosaic.version = 11 : i64} {
  func.func @_ln_qkv_kernel(%arg0: i32, %arg1: memref<96x64xf32, #tpu.memory_space<vmem>>, %arg2: memref<1x64xf32, #tpu.memory_space<vmem>>, %arg3: memref<1x64xf32, #tpu.memory_space<vmem>>, %arg4: memref<64x64xbf16, #tpu.memory_space<vmem>>, %arg5: memref<64x64xbf16, #tpu.memory_space<vmem>>, %arg6: memref<64x64xbf16, #tpu.memory_space<vmem>>, %arg7: memref<96x64xbf16, #tpu.memory_space<vmem>>, %arg8: memref<96x64xbf16, #tpu.memory_space<vmem>>, %arg9: memref<96x64xbf16, #tpu.memory_space<vmem>>) attributes {dimension_semantics = [#tpu.dimension_semantics<parallel>], iteration_bounds = array<i64: 1>, scalar_prefetch = 0 : i64, scratch_operands = 0 : i64, tpu.core_type = #tpu.core_type<tc>, window_params = [{transform_indices = @transform_0, window_bounds = array<i64: 96, 64>}, {pipeline_mode = #tpu.pipeline_mode<synchronous>, transform_indices = @transform_1, window_bounds = array<i64: 1, 64>}, {pipeline_mode = #tpu.pipeline_mode<synchronous>, transform_indices = @transform_2, window_bounds = array<i64: 1, 64>}, {pipeline_mode = #tpu.pipeline_mode<synchronous>, transform_indices = @transform_3, window_bounds = array<i64: 64, 64>}, {pipeline_mode = #tpu.pipeline_mode<synchronous>, transform_indices = @transform_4, window_bounds = array<i64: 64, 64>}, {pipeline_mode = #tpu.pipeline_mode<synchronous>, transform_indices = @transform_5, window_bounds = array<i64: 64, 64>}, {transform_indices = @transform_6, window_bounds = array<i64: 96, 64>}, {transform_indices = @transform_7, window_bounds = array<i64: 96, 64>}, {transform_indices = @transform_8, window_bounds = array<i64: 96, 64>}]} {
    %c0 = arith.constant 0 : index
    %c0_0 = arith.constant 0 : index
    %0 = vector.load %arg1[%c0, %c0_0] : memref<96x64xf32, #tpu.memory_space<vmem>>, vector<96x64xf32>
    %cst = arith.constant dense<0.000000e+00> : vector<96xf32>
    %1 = vector.multi_reduction <add>, %0, %cst [1] : vector<96x64xf32> to vector<96xf32>
    %2 = vector.shape_cast %1 : vector<96xf32> to vector<96x1xf32>
    %cst_1 = arith.constant 6.400000e+01 : f32
    %3 = vector.broadcast %cst_1 : f32 to vector<96x1xf32>
    %4 = arith.divf %2, %3 : vector<96x1xf32>
    %5 = vector.broadcast %4 : vector<96x1xf32> to vector<96x64xf32>
    %6 = arith.subf %0, %5 : vector<96x64xf32>
    %7 = arith.mulf %6, %6 : vector<96x64xf32>
    %cst_2 = arith.constant dense<0.000000e+00> : vector<96xf32>
    %8 = vector.multi_reduction <add>, %7, %cst_2 [1] : vector<96x64xf32> to vector<96xf32>
    %9 = vector.shape_cast %8 : vector<96xf32> to vector<96x1xf32>
    %cst_3 = arith.constant 6.400000e+01 : f32
    %10 = vector.broadcast %cst_3 : f32 to vector<96x1xf32>
    %11 = arith.divf %9, %10 : vector<96x1xf32>
    %12 = vector.broadcast %4 : vector<96x1xf32> to vector<96x64xf32>
    %13 = arith.subf %0, %12 : vector<96x64xf32>
    %cst_4 = arith.constant 9.99999974E-6 : f32
    %14 = vector.broadcast %cst_4 : f32 to vector<96x1xf32>
    %15 = arith.addf %11, %14 : vector<96x1xf32>
    %16 = math.rsqrt %15 : vector<96x1xf32>
    %17 = vector.broadcast %16 : vector<96x1xf32> to vector<96x64xf32>
    %18 = arith.mulf %13, %17 : vector<96x64xf32>
    %c0_5 = arith.constant 0 : index
    %c0_6 = arith.constant 0 : index
    %19 = vector.load %arg2[%c0_5, %c0_6] : memref<1x64xf32, #tpu.memory_space<vmem>>, vector<1x64xf32>
    %20 = vector.broadcast %19 : vector<1x64xf32> to vector<96x64xf32>
    %21 = arith.mulf %18, %20 : vector<96x64xf32>
    %c0_7 = arith.constant 0 : index
    %c0_8 = arith.constant 0 : index
    %22 = vector.load %arg3[%c0_7, %c0_8] : memref<1x64xf32, #tpu.memory_space<vmem>>, vector<1x64xf32>
    %23 = vector.broadcast %22 : vector<1x64xf32> to vector<96x64xf32>
    %24 = arith.addf %21, %23 : vector<96x64xf32>
    %25 = arith.truncf %24 : vector<96x64xf32> to vector<96x64xbf16>
    %c0_9 = arith.constant 0 : index
    %c0_10 = arith.constant 0 : index
    %26 = vector.load %arg4[%c0_9, %c0_10] : memref<64x64xbf16, #tpu.memory_space<vmem>>, vector<64x64xbf16>
    %cst_11 = arith.constant dense<0.000000e+00> : vector<96x64xf32>
    %27 = tpu.matmul %25, %26, %cst_11 {dimension_numbers = #tpu.dot_dimension_numbers<[1], [0], [0], [1], [0, 0, 1, 1], [], []>} : vector<96x64xbf16>, vector<64x64xbf16>, vector<96x64xf32> -> vector<96x64xf32>
    %28 = arith.truncf %27 : vector<96x64xf32> to vector<96x64xbf16>
    %c0_12 = arith.constant 0 : index
    %c0_13 = arith.constant 0 : index
    %29 = vector.load %arg7[%c0_12, %c0_13] : memref<96x64xbf16, #tpu.memory_space<vmem>>, vector<96x64xbf16>
    tpu.vector_store %arg7[%c0_12, %c0_13], %28 {strides = array<i32>} : memref<96x64xbf16, #tpu.memory_space<vmem>>, vector<96x64xbf16>,
    %c0_14 = arith.constant 0 : index
    %c0_15 = arith.constant 0 : index
    %30 = vector.load %arg5[%c0_14, %c0_15] : memref<64x64xbf16, #tpu.memory_space<vmem>>, vector<64x64xbf16>
    %cst_16 = arith.constant dense<0.000000e+00> : vector<96x64xf32>
    %31 = tpu.matmul %25, %30, %cst_16 {dimension_numbers = #tpu.dot_dimension_numbers<[1], [0], [0], [1], [0, 0, 1, 1], [], []>} : vector<96x64xbf16>, vector<64x64xbf16>, vector<96x64xf32> -> vector<96x64xf32>
    %32 = arith.truncf %31 : vector<96x64xf32> to vector<96x64xbf16>
    %c0_17 = arith.constant 0 : index
    %c0_18 = arith.constant 0 : index
    %33 = vector.load %arg8[%c0_17, %c0_18] : memref<96x64xbf16, #tpu.memory_space<vmem>>, vector<96x64xbf16>
    tpu.vector_store %arg8[%c0_17, %c0_18], %32 {strides = array<i32>} : memref<96x64xbf16, #tpu.memory_space<vmem>>, vector<96x64xbf16>,
    %c0_19 = arith.constant 0 : index
    %c0_20 = arith.constant 0 : index
    %34 = vector.load %arg6[%c0_19, %c0_20] : memref<64x64xbf16, #tpu.memory_space<vmem>>, vector<64x64xbf16>
    %cst_21 = arith.constant dense<0.000000e+00> : vector<96x64xf32>
    %35 = tpu.matmul %25, %34, %cst_21 {dimension_numbers = #tpu.dot_dimension_numbers<[1], [0], [0], [1], [0, 0, 1, 1], [], []>} : vector<96x64xbf16>, vector<64x64xbf16>, vector<96x64xf32> -> vector<96x64xf32>
    %36 = arith.truncf %35 : vector<96x64xf32> to vector<96x64xbf16>
    %c0_22 = arith.constant 0 : index
    %c0_23 = arith.constant 0 : index
    %37 = vector.load %arg9[%c0_22, %c0_23] : memref<96x64xbf16, #tpu.memory_space<vmem>>, vector<96x64xbf16>
    tpu.vector_store %arg9[%c0_22, %c0_23], %36 {strides = array<i32>} : memref<96x64xbf16, #tpu.memory_space<vmem>>, vector<96x64xbf16>,
    return
  }
  func.func @transform_0(%arg0: i32) -> (i32, i32) {
    %c0_i32 = arith.constant 0 : i32
    %c0_i32_0 = arith.constant 0 : i32
    return %arg0, %c0_i32 : i32, i32
  }
  func.func @transform_1(%arg0: i32) -> (i32, i32) {
    %c0_i32 = arith.constant 0 : i32
    %c0_i32_0 = arith.constant 0 : i32
    %c0_i32_1 = arith.constant 0 : i32
    return %c0_i32, %c0_i32_0 : i32, i32
  }
  func.func @transform_2(%arg0: i32) -> (i32, i32) {
    %c0_i32 = arith.constant 0 : i32
    %c0_i32_0 = arith.constant 0 : i32
    %c0_i32_1 = arith.constant 0 : i32
    return %c0_i32, %c0_i32_0 : i32, i32
  }
  func.func @transform_3(%arg0: i32) -> (i32, i32) {
    %c0_i32 = arith.constant 0 : i32
    %c0_i32_0 = arith.constant 0 : i32
    %c0_i32_1 = arith.constant 0 : i32
    return %c0_i32, %c0_i32_0 : i32, i32
  }
  func.func @transform_4(%arg0: i32) -> (i32, i32) {
    %c0_i32 = arith.constant 0 : i32
    %c0_i32_0 = arith.constant 0 : i32
    %c0_i32_1 = arith.constant 0 : i32
    return %c0_i32, %c0_i32_0 : i32, i32
  }
  func.func @transform_5(%arg0: i32) -> (i32, i32) {
    %c0_i32 = arith.constant 0 : i32
    %c0_i32_0 = arith.constant 0 : i32
    %c0_i32_1 = arith.constant 0 : i32
    return %c0_i32, %c0_i32_0 : i32, i32
  }
  func.func @transform_6(%arg0: i32) -> (i32, i32) {
    %c0_i32 = arith.constant 0 : i32
    %c0_i32_0 = arith.constant 0 : i32
    return %arg0, %c0_i32 : i32, i32
  }
  func.func @transform_7(%arg0: i32) -> (i32, i32) {
    %c0_i32 = arith.constant 0 : i32
    %c0_i32_0 = arith.constant 0 : i32
    return %arg0, %c0_i32 : i32, i32
  }
  func.func @transform_8(%arg0: i32) -> (i32, i32) {
    %c0_i32 = arith.constant 0 : i32
    %c0_i32_0 = arith.constant 0 : i32
    return %arg0, %c0_i32 : i32, i32
  }
}

</mosaic_0001>

<bundles_post_ra>
// kernel: tpu_custom_call.1
= control target key start
LH: loop header
LB: loop body
LE: loop exit
PB: predicated region body
PF: predicated region fallthrough
CT: control target
= control target key end

     0   :  { %vm39_vm0 = vcmask 523264   ;;  %vm420_vm1 = vcmask 519168   ;;  %s1447_s0 = inlined_call_operand.vmem [shape: f32[96,64], index: 0, kind: input, shape index: {}]   ;;  %s1448_s3 = inlined_call_operand.vmem [shape: bf16[64,64], index: 3, kind: input, shape index: {}]   ;;  %s1449_s4 = inlined_call_operand.vmem [shape: bf16[64,64], index: 4, kind: input, shape index: {}]   ;;  %s1450_s5 = inlined_call_operand.vmem [shape: bf16[64,64], index: 5, kind: input, shape index: {}]   ;;  %s1451_s1 = inlined_call_operand.vmem [shape: f32[1,64], index: 1, kind: input, shape index: {}]   ;;  %s1452_s2 = inlined_call_operand.vmem [shape: f32[1,64], index: 2, kind: input, shape index: {}]   ;;  %s1453_s6 = inlined_call_operand.vmem [shape: bf16[96,64], index: 6, kind: output, shape index: {0}]   ;;  %s1454_s7 = inlined_call_operand.vmem [shape: bf16[96,64], index: 7, kind: output, shape index: {1}]   ;;  %s1455_s8 = inlined_call_operand.vmem [shape: bf16[96,64], index: 8, kind: output, shape index: {2}]  }
   0x1   :  { %v27_v0 = vld [vmem:[%s1447_s0] sm:$0xff]  ;;  %v29_v1 = vld [vmem:[%s1447_s0 + $0x10] sm:$0xff]  ;;  %v28_v2 = vld [vmem:[%s1447_s0 + $0x8] sm:$0xff] }
   0x2   :  { %v40_v3 = vsel %vm39_vm0, %v27_v0, 0.0  ;;  %v46_v4 = vsel %vm39_vm0, %v29_v1, 0.0  ;;  %v30_v5 = vld [vmem:[%s1447_s0 + $0x18] sm:$0xff]  ;;  %v43_v6 = vsel %vm39_vm0, %v28_v2, 0.0  ;;  %v35_v8 = vld [vmem:[%s1447_s0 + $0x40] sm:$0xff]  ;;  %v36_v9 = vld [vmem:[%s1447_s0 + $0x48] sm:$0xff] }
   0x3   :  { %41 = vadd.xlane.f32.xlu0 %v40_v3  ;;  %47 = vadd.xlane.f32.xlu1 %v46_v4  ;;  %v49_v7 = vsel %vm39_vm0, %v30_v5, 0.0  ;;  %v64_v10 = vsel %vm39_vm0, %v35_v8, 0.0  ;;  %v67_v11 = vsel %vm39_vm0, %v36_v9, 0.0  ;;  %v37_v12 = vld [vmem:[%s1447_s0 + $0x50] sm:$0xff]  ;;  %v38_v13 = vld [vmem:[%s1447_s0 + $0x58] sm:$0xff]  ;;  %v31_v16 = vld [vmem:[%s1447_s0 + $0x20] sm:$0xff] }
   0x4   :  { %v70_v14 = vsel %vm39_vm0, %v37_v12, 0.0  ;;  %v73_v15 = vsel %vm39_vm0, %v38_v13, 0.0  ;;  %v32_v17 = vld [vmem:[%s1447_s0 + $0x28] sm:$0xff]  ;;  %v52_v18 = vsel %vm39_vm0, %v31_v16, 0.0  ;;  %v1117_v20 = vld [vmem:[%s1447_s0 + $0x30] sm:$0xff]  ;;  %v1122_v21 = vld [vmem:[%s1447_s0 + $0x38] sm:$0xff] }
   0x5   :  { %v55_v19 = vsel %vm39_vm0, %v32_v17, 0.0  ;;  %v58_v22 = vsel %vm39_vm0, %v1117_v20, 0.0  ;;  %v61_v23 = vsel %vm39_vm0, %v1122_v21, 0.0 }
   0x7   :  { %44 = vadd.xlane.f32.xlu0 %v43_v6  ;;  %50 = vadd.xlane.f32.xlu1 %v49_v7 }
   0xb   :  { %65 = vadd.xlane.f32.xlu0 %v64_v10  ;;  %68 = vadd.xlane.f32.xlu1 %v67_v11 }
   0xf   :  { %71 = vadd.xlane.f32.xlu0 %v70_v14  ;;  %74 = vadd.xlane.f32.xlu1 %v73_v15 }
  0x13   :  { %53 = vadd.xlane.f32.xlu0 %v52_v18  ;;  %56 = vadd.xlane.f32.xlu1 %v55_v19 }
  0x17   :  { %59 = vadd.xlane.f32.xlu0 %v58_v22  ;;  %62 = vadd.xlane.f32.xlu1 %v61_v23  ;;  %v995_v22 = vld [vmem:[%s1448_s3 + $0x10] sm:$0xff]   ;;  %v996_v23 = vld [vmem:[%s1448_s3 + $0x18] sm:$0xff]  }
  0x90   :  { %v42_v24 = vpop.xlane.xlu0 %41  ;;  %v48_v25 = vpop.xlane.xlu1 %47 }
  0x91   :  { %v77_v26 = vmul.f32 0.015625, %v42_v24  ;;  %v79_v27 = vmul.f32 0.015625, %v48_v25  ;;  %v1205_v24 = vld [vmem:[%s1449_s4] sm:$0xff]  }
  0x92   :  { %v1210_v25 = vld [vmem:[%s1450_s5] sm:$0xff]  }
  0x93   :  { %v1128_v28 = vsub.f32 %v27_v0, %v77_v26  ;;  %v1130_v29 = vsub.f32 %v29_v1, %v79_v27 }
  0x94   :  { %v45_v30 = vpop.xlane.xlu0 %44  ;;  %v51_v31 = vpop.xlane.xlu1 %50 }
  0x95   :  { %v78_v32 = vmul.f32 0.015625, %v45_v30  ;;  %v80_v33 = vmul.f32 0.015625, %v51_v31  ;;  %v101_v34 = vmul.f32 %v1128_v28, %v1128_v28  ;;  %v103_v35 = vmul.f32 %v1130_v29, %v1130_v29 }
  0x97   :  { %v1136_v36 = vsub.f32 %v28_v2, %v78_v32  ;;  %v1138_v37 = vsub.f32 %v30_v5, %v80_v33  ;;  %v113_v38 = vsel %vm39_vm0, %v101_v34, 0.0  ;;  %v119_v41 = vsel %vm39_vm0, %v103_v35, 0.0 }
  0x98   :  { %114 = vadd.xlane.f32.xlu0 %v113_v38  ;;  %v66_v39 = vpop.xlane.xlu0 %65  ;;  %v69_v40 = vpop.xlane.xlu1 %68 }
  0x99   :  { %v85_v42 = vmul.f32 0.015625, %v66_v39  ;;  %v86_v43 = vmul.f32 0.015625, %v69_v40  ;;  %v102_v44 = vmul.f32 %v1136_v36, %v1136_v36  ;;  %v104_v45 = vmul.f32 %v1138_v37, %v1138_v37 }
  0x9b   :  { %v1146_v46 = vsub.f32 %v35_v8, %v85_v42  ;;  %v1148_v47 = vsub.f32 %v36_v9, %v86_v43  ;;  %v116_v48 = vsel %vm39_vm0, %v102_v44, 0.0  ;;  %v122_v51 = vsel %vm39_vm0, %v104_v45, 0.0 }
  0x9c   :  { %120 = vadd.xlane.f32.xlu0 %v119_v41  ;;  %117 = vadd.xlane.f32.xlu1 %v116_v48  ;;  %v72_v49 = vpop.xlane.xlu0 %71  ;;  %v75_v50 = vpop.xlane.xlu1 %74 }
  0x9d   :  { %v87_v52 = vmul.f32 0.015625, %v72_v49  ;;  %v88_v53 = vmul.f32 0.015625, %v75_v50  ;;  %v109_v54 = vmul.f32 %v1146_v46, %v1146_v46  ;;  %v110_v55 = vmul.f32 %v1148_v47, %v1148_v47 }
  0x9f   :  { %v1156_v56 = vsub.f32 %v37_v12, %v87_v52  ;;  %v1158_v57 = vsub.f32 %v38_v13, %v88_v53  ;;  %v137_v58 = vsel %vm39_vm0, %v109_v54, 0.0  ;;  %v140_v61 = vsel %vm39_vm0, %v110_v55, 0.0 }
  0xa0   :  { %123 = vadd.xlane.f32.xlu1 %v122_v51  ;;  %138 = vadd.xlane.f32.xlu0 %v137_v58  ;;  %v54_v59 = vpop.xlane.xlu0 %53  ;;  %v57_v60 = vpop.xlane.xlu1 %56 }
  0xa1   :  { %v81_v62 = vmul.f32 0.015625, %v54_v59  ;;  %v82_v63 = vmul.f32 0.015625, %v57_v60  ;;  %v111_v0 = vmul.f32 %v1156_v56, %v1156_v56  ;;  %v112_v1 = vmul.f32 %v1158_v57, %v1158_v57 }
  0xa3   :  { %v1166_v2 = vsub.f32 %v31_v16, %v81_v62  ;;  %v1168_v3 = vsub.f32 %v32_v17, %v82_v63  ;;  %v143_v4 = vsel %vm39_vm0, %v111_v0, 0.0  ;;  %v146_v7 = vsel %vm39_vm0, %v112_v1, 0.0 }
  0xa4   :  { %141 = vadd.xlane.f32.xlu1 %v140_v61  ;;  %144 = vadd.xlane.f32.xlu0 %v143_v4  ;;  %v60_v5 = vpop.xlane.xlu0 %59  ;;  %v63_v6 = vpop.xlane.xlu1 %62  ;;  %v1218_v61 = vld [vmem:[%s1451_s1] ss:$0 sm:$0xff] }
  0xa5   :  { %v83_v8 = vmul.f32 0.015625, %v60_v5  ;;  %v84_v9 = vmul.f32 0.015625, %v63_v6  ;;  %v105_v10 = vmul.f32 %v1166_v2, %v1166_v2  ;;  %v106_v11 = vmul.f32 %v1168_v3, %v1168_v3 }
  0xa7   :  { %v1177_v12 = vsub.f32 %v1117_v20, %v83_v8  ;;  %v1180_v13 = vsub.f32 %v1122_v21, %v84_v9  ;;  %v125_v14 = vsel %vm39_vm0, %v105_v10, 0.0  ;;  %v128_v15 = vsel %vm39_vm0, %v106_v11, 0.0  ;;  %v993_v20 = vld [vmem:[%s1448_s3] sm:$0xff]   ;;  %v994_v21 = vld [vmem:[%s1448_s3 + $0x8] sm:$0xff]  }
  0xa8   :  { %147 = vadd.xlane.f32.xlu1 %v146_v7  ;;  %126 = vadd.xlane.f32.xlu0 %v125_v14  ;;  %v1226_v10 = vld [vmem:[%s1452_s2] ss:$0 sm:$0xff] }
  0xa9   :  { %v107_v16 = vmul.f32 %v1177_v12, %v1177_v12  ;;  %v108_v17 = vmul.f32 %v1180_v13, %v1180_v13  ;;  %925 = vmatprep.subr.bf16.mxu0 %v993_v20  ;;  %985 = vmatprep.subr.bf16.mxu1 %v993_v20 }
  0xaa   :  { %926 = vmatpush3.bf16.msra.mxu0 %v993_v20  ;;  %989 = vmatpush3.bf16.msra.mxu1 %v993_v20 }
  0xab   :  { %v131_v18 = vsel %vm39_vm0, %v107_v16, 0.0  ;;  %v134_v19 = vsel %vm39_vm0, %v108_v17, 0.0  ;;  %927 = vmatprep.subr.bf16.mxu0 %v994_v21  ;;  %986 = vmatprep.subr.bf16.mxu1 %v994_v21 }
  0xac   :  { %129 = vadd.xlane.f32.xlu1 %v128_v15  ;;  %132 = vadd.xlane.f32.xlu0 %v131_v18 }
  0xae   :  { %928 = vmatpush3.bf16.msra.mxu0 %v994_v21  ;;  %990 = vmatpush3.bf16.msra.mxu1 %v994_v21 }
  0xaf   :  { %929 = vmatprep.subr.bf16.mxu0 %v995_v22  ;;  %987 = vmatprep.subr.bf16.mxu1 %v995_v22 }
  0xb0   :  { %135 = vadd.xlane.f32.xlu1 %v134_v19 }
  0xb2   :  { %930 = vmatpush3.bf16.msra.mxu0 %v995_v22  ;;  %991 = vmatpush3.bf16.msra.mxu1 %v995_v22 }
  0xb3   :  { %931 = vmatprep.subr.bf16.mxu0 %v996_v23  ;;  %988 = vmatprep.subr.bf16.mxu1 %v996_v23 }
  0xb6   :  { %932 = vmatpush3.bf16.msra.mxu0 %v996_v23  ;;  %992 = vmatpush3.bf16.msra.mxu1 %v996_v23 }
  0xb7   :  { %945 = vmatprep.subr.bf16.mxu1 %v1205_v24  ;;  %965 = vmatprep.subr.bf16.mxu0 %v1210_v25 }
 0x125   :  { %v115_v26 = vpop.xlane.xlu0 %114 }
 0x126   :  { %v149_v27 = vmul.f32 0.015625, %v115_v26 }
 0x128   :  { %v161_v30 = vadd.f32 1e-05, %v149_v27 }
 0x129   :  { %v118_v31 = vpop.xlane.xlu1 %117  ;;  %v121_v32 = vpop.xlane.xlu0 %120 }
 0x12a   :  { %1005 = vrsqrt.f32 %v161_v30  ;;  %v150_v33 = vmul.f32 0.015625, %v118_v31  ;;  %v151_v34 = vmul.f32 0.015625, %v121_v32 }
 0x12c   :  { %v162_v35 = vadd.f32 1e-05, %v150_v33  ;;  %v163_v38 = vadd.f32 1e-05, %v151_v34 }
 0x12d   :  { %v124_v39 = vpop.xlane.xlu1 %123  ;;  %v139_v40 = vpop.xlane.xlu0 %138 }
 0x12e   :  { %1007 = vrsqrt.f32 %v162_v35  ;;  %v152_v41 = vmul.f32 0.015625, %v124_v39  ;;  %v157_v42 = vmul.f32 0.015625, %v139_v40  ;;  %v1000_v39 = vld [vmem:[%s1450_s5 + $0x8] sm:$0xff]  }
 0x12f   :  { %1009 = vrsqrt.f32 %v163_v38 }
 0x130   :  { %v164_v43 = vadd.f32 1e-05, %v152_v41  ;;  %v169_v44 = vadd.f32 1e-05, %v157_v42 }
 0x131   :  { %v142_v45 = vpop.xlane.xlu1 %141  ;;  %v145_v48 = vpop.xlane.xlu0 %144 }
 0x132   :  { %1011 = vrsqrt.f32 %v164_v43  ;;  %v158_v49 = vmul.f32 0.015625, %v142_v45  ;;  %v159_v50 = vmul.f32 0.015625, %v145_v48 }
 0x133   :  { %1013 = vrsqrt.f32 %v169_v44 }
 0x134   :  { %v1006_v51 = vpop.eup %1005  ;;  %v170_v52 = vadd.f32 1e-05, %v158_v49  ;;  %v171_v53 = vadd.f32 1e-05, %v159_v50 }
 0x135   :  { %v148_v54 = vpop.xlane.xlu1 %147  ;;  %v127_v55 = vpop.xlane.xlu0 %126  ;;  %v185_v58 = vmul.f32 %v1006_v51, %v1128_v28 }
 0x136   :  { %1015 = vrsqrt.f32 %v170_v52  ;;  %v160_v59 = vmul.f32 0.015625, %v148_v54  ;;  %v153_v60 = vmul.f32 0.015625, %v127_v55  ;;  %v999_v55 = vld [vmem:[%s1449_s4 + $0x8] sm:$0xff]  }
 0x137   :  { %1017 = vrsqrt.f32 %v171_v53  ;;  %v204_v7 = vmul.f32 %v1218_v61, %v185_v58 }
 0x138   :  { %v1008_v62 = vpop.eup %1007  ;;  %v172_v63 = vadd.f32 1e-05, %v160_v59  ;;  %v165_v0 = vadd.f32 1e-05, %v153_v60  ;;  %v1004_v59 = vld [vmem:[%s1450_s5 + $0x18] sm:$0xff]  }
 0x139   :  { %v1010_v1 = vpop.eup %1009  ;;  %v130_v4 = vpop.xlane.xlu1 %129  ;;  %v186_v6 = vmul.f32 %v1008_v62, %v1136_v36 }
 0x13a   :  { %v133_v5 = vpop.xlane.xlu0 %132  ;;  %v187_v28 = vmul.f32 %v1010_v1, %v1130_v29  ;;  %1019 = vrsqrt.f32 %v172_v63  ;;  %v154_v8 = vmul.f32 0.015625, %v130_v4  ;;  %v223_v29 = vadd.f32 %v1226_v10, %v204_v7  ;;  %v1001_v1 = vld [vmem:[%s1449_s4 + $0x10] sm:$0xff]  }
 0x13b   :  { %v155_v9 = vmul.f32 0.015625, %v133_v5  ;;  %1021 = vrsqrt.f32 %v165_v0  ;;  %v205_v11 = vmul.f32 %v1218_v61, %v186_v6  ;;  %v1003_v6 = vld [vmem:[%s1449_s4 + $0x18] sm:$0xff]  }
 0x13c   :  { %v1012_v14 = vpop.eup %1011  ;;  %v166_v15 = vadd.f32 1e-05, %v154_v8  ;;  %v206_v20 = vmul.f32 %v1218_v61, %v187_v28 }
 0x13d   :  { %v167_v16 = vadd.f32 1e-05, %v155_v9  ;;  %v1014_v17 = vpop.eup %1013  ;;  %v188_v36 = vmul.f32 %v1012_v14, %v1138_v37  ;;  %v136_v18 = vpop.xlane.xlu1 %135  ;;  %v224_v19 = vadd.f32 %v1226_v10, %v205_v11 }
 0x13e   :  { %1023 = vrsqrt.f32 %v166_v15  ;;  %v156_v21 = vmul.f32 0.015625, %v136_v18  ;;  %v193_v22 = vmul.f32 %v1014_v17, %v1146_v46  ;;  %v225_v37 = vadd.f32 %v1226_v10, %v206_v20 }
 0x13f   :  { %1025 = vrsqrt.f32 %v167_v16  ;;  %v1234_v23 = vpack.c.bf16 %v224_v19, %v223_v29  ;;  %v207_v26 = vmul.f32 %v1218_v61, %v188_v36 }
 0x140   :  { %v1016_v27 = vpop.eup %1015  ;;  %v168_v30 = vadd.f32 1e-05, %v156_v21  ;;  %v212_v34 = vmul.f32 %v1218_v61, %v193_v22 }
 0x141   :  { %v1018_v31 = vpop.eup %1017  ;;  %933 = vmatprep.mubr.msk.bf16.mxu0 %vm39_vm0, %v1234_v23  ;;  %v226_v32 = vadd.f32 %v1226_v10, %v207_v26  ;;  %v194_v33 = vmul.f32 %v1016_v27, %v1148_v47 }
 0x142   :  { %v195_v46 = vmul.f32 %v1018_v31, %v1156_v56  ;;  %1027 = vrsqrt.f32 %v168_v30  ;;  %v231_v47 = vadd.f32 %v1226_v10, %v212_v34 }
 0x143   :  { %v236_v35 = vpack.c.bf16 %v226_v32, %v225_v37  ;;  %v213_v38 = vmul.f32 %v1218_v61, %v194_v33 }
 0x144   :  { %v1020_v40 = vpop.eup %1019  ;;  %v214_v56 = vmul.f32 %v1218_v61, %v195_v46 }
 0x145   :  { %v1022_v41 = vpop.eup %1021  ;;  %v196_v42 = vmul.f32 %v1020_v40, %v1158_v57  ;;  %934 = vmatmul.mubr.msk.bf16.vlgmr.msra.gmra.mrb[0].mxu0 %vm39_vm0, %v236_v35  ;;  %v232_v43 = vadd.f32 %v1226_v10, %v213_v38  ;;  %v1002_v57 = vld [vmem:[%s1450_s5 + $0x10] sm:$0xff]  }
 0x146   :  { %v189_v44 = vmul.f32 %v1022_v41, %v1166_v2  ;;  %966 = vmatpush3.bf16.msra.mxu0 %v1210_v25  ;;  %v233_v52 = vadd.f32 %v1226_v10, %v214_v56 }
 0x147   :  { %v239_v45 = vpack.c.bf16 %v232_v43, %v231_v47  ;;  %v215_v48 = vmul.f32 %v1218_v61, %v196_v42  ;;  %967 = vmatprep.subr.bf16.mxu0 %v1000_v39 }
 0x148   :  { %v1024_v49 = vpop.eup %1023  ;;  %v208_v25 = vmul.f32 %v1218_v61, %v189_v44 }
 0x149   :  { %v1026_v50 = vpop.eup %1025  ;;  %v190_v51 = vmul.f32 %v1024_v49, %v1168_v3  ;;  %941 = vmatprep.mubr.msk.bf16.mxu1 %vm39_vm0, %v239_v45  ;;  %v234_v2 = vadd.f32 %v1226_v10, %v215_v48 }
 0x14a   :  { %v191_v53 = vmul.f32 %v1026_v50, %v1177_v12  ;;  %968 = vmatpush3.bf16.msra.mxu0 %v1000_v39  ;;  %v227_v12 = vadd.f32 %v1226_v10, %v208_v25 }
 0x14b   :  { %v240_v54 = vpack.c.bf16 %v234_v2, %v233_v52  ;;  %v209_v58 = vmul.f32 %v1218_v61, %v190_v51  ;;  %969 = vmatprep.subr.bf16.mxu0 %v1002_v57 }
 0x14c   :  { %v1028_v3 = vpop.eup %1027  ;;  %v210_v63 = vmul.f32 %v1218_v61, %v191_v53 }
 0x14d   :  { %v192_v60 = vmul.f32 %v1028_v3, %v1180_v13  ;;  %942 = vmatmul.mubr.msk.bf16.vlgmr.msra.gmra.mrb[0].mxu1 %vm39_vm0, %v240_v54  ;;  %v228_v62 = vadd.f32 %v1226_v10, %v209_v58 }
 0x14e   :  { %946 = vmatpush3.bf16.msra.mxu1 %v1205_v24  ;;  %953 = vmatprep.mubr.msk.bf16.mxu1 %vm39_vm0, %v1234_v23  ;;  %v229_v4 = vadd.f32 %v1226_v10, %v210_v63 }
 0x14f   :  { %947 = vmatprep.subr.bf16.mxu1 %v999_v55  ;;  %v237_v0 = vpack.c.bf16 %v228_v62, %v227_v12  ;;  %v211_v13 = vmul.f32 %v1218_v61, %v192_v60  ;;  %970 = vmatpush3.bf16.msra.mxu0 %v1002_v57 }
 0x150   :  { %971 = vmatprep.subr.bf16.mxu0 %v1004_v59 }
 0x151   :  { %937 = vmatprep.mubr.msk.bf16.mxu0 %vm39_vm0, %v237_v0  ;;  %v230_v5 = vadd.f32 %v1226_v10, %v211_v13 }
 0x152   :  { %948 = vmatpush3.bf16.msra.mxu1 %v999_v55 }
 0x153   :  { %949 = vmatprep.subr.bf16.mxu1 %v1001_v1  ;;  %v238_v24 = vpack.c.bf16 %v230_v5, %v229_v4  ;;  %972 = vmatpush3.bf16.msra.mxu0 %v1004_v59 }
 0x155   :  { %938 = vmatmul.mubr.msk.bf16.gmra.mrb[4].mxu0 %vm39_vm0, %v238_v24 }
 0x156   :  { %950 = vmatpush3.bf16.msra.mxu1 %v1001_v1  ;;  %973 = vmatprep.mubr.msk.bf16.mxu0 %vm39_vm0, %v1234_v23 }
 0x157   :  { %951 = vmatprep.subr.bf16.mxu1 %v1003_v6 }
 0x15a   :  { %952 = vmatpush3.bf16.msra.mxu1 %v1003_v6 }
 0x15d   :  { %954 = vmatmul.mubr.msk.bf16.vlgmr.msra.gmra.mrb[4].mxu1 %vm39_vm0, %v236_v35  ;;  %974 = vmatmul.mubr.msk.bf16.vlgmr.msra.gmra.mrb[8].mxu0 %vm39_vm0, %v236_v35 }
 0x15e   :  { %957 = vmatprep.mubr.msk.bf16.mxu1 %vm39_vm0, %v237_v0  ;;  %977 = vmatprep.mubr.msk.bf16.mxu0 %vm39_vm0, %v237_v0 }
 0x165   :  { %958 = vmatmul.mubr.msk.bf16.gmra.mrb[8].mxu1 %vm39_vm0, %v238_v24  ;;  %978 = vmatmul.mubr.msk.bf16.gmra.mrb[12].mxu0 %vm39_vm0, %v238_v24 }
 0x166   :  { %961 = vmatprep.mubr.msk.bf16.mxu1 %vm39_vm0, %v239_v45  ;;  %981 = vmatprep.mubr.msk.bf16.mxu0 %vm39_vm0, %v239_v45 }
 0x16d   :  { %962 = vmatmul.mubr.msk.bf16.gmra.mrb[12].mxu1 %vm39_vm0, %v240_v54  ;;  %982 = vmatmul.mubr.msk.bf16.gmra.mrb[16].mxu0 %vm39_vm0, %v240_v54 }
 0x218   :  { %v935_v61 = vpop.f32.mrb[0].mxu0 }
 0x219   :  { %v861_v7 = vpack.c.bf16 %v935_v61, %v935_v61  ;;  %v325_v28 = vpop.f32.mrb[1].mxu0 }
 0x21a   :  { %v859_v8 = vpack.c.bf16 %v325_v28, %v325_v28  ;;  %v936_v9 = vpop.f32.mrb[2].mxu0 }
 0x21b   :  { %423 = vst.msk [vmem:[%s1453_s6 + $0x8] sm:$0xf] %vm420_vm1, %v861_v7  ;;  %v862_v10 = vpack.c.bf16 %v936_v9, %v936_v9  ;;  %v328_v11 = vpop.f32.mrb[3].mxu0 }
 0x21c   :  { %421 = vst.msk [vmem:[%s1453_s6] sm:$0xf] %vm420_vm1, %v859_v8  ;;  %v860_v14 = vpack.c.bf16 %v328_v11, %v328_v11 }
 0x21d   :  { %424 = vst.msk [vmem:[%s1453_s6 + $0xc] sm:$0xf] %vm420_vm1, %v862_v10 }
 0x21e   :  { %422 = vst.msk [vmem:[%s1453_s6 + $0x4] sm:$0xf] %vm420_vm1, %v860_v14 }
 0x220   :  { %v943_v15 = vpop.f32.mrb[0].mxu1 }
 0x221   :  { %v869_v16 = vpack.c.bf16 %v943_v15, %v943_v15  ;;  %v357_v17 = vpop.f32.mrb[1].mxu1 }
 0x222   :  { %v867_v36 = vpack.c.bf16 %v357_v17, %v357_v17  ;;  %v944_v18 = vpop.f32.mrb[2].mxu1 }
 0x223   :  { %431 = vst.msk [vmem:[%s1453_s6 + $0x28] sm:$0xf] %vm420_vm1, %v869_v16  ;;  %v870_v29 = vpack.c.bf16 %v944_v18, %v944_v18  ;;  %v360_v19 = vpop.f32.mrb[3].mxu1 }
 0x224   :  { %429 = vst.msk [vmem:[%s1453_s6 + $0x20] sm:$0xf] %vm420_vm1, %v867_v36  ;;  %v868_v20 = vpack.c.bf16 %v360_v19, %v360_v19 }
 0x225   :  { %432 = vst.msk [vmem:[%s1453_s6 + $0x2c] sm:$0xf] %vm420_vm1, %v870_v29 }
 0x226   :  { %430 = vst.msk [vmem:[%s1453_s6 + $0x24] sm:$0xf] %vm420_vm1, %v868_v20 }
 0x228   :  { %v939_v21 = vpop.f32.mrb[4].mxu0 }
 0x229   :  { %v865_v22 = vpack.c.bf16 %v939_v21, %v939_v21  ;;  %v341_v23 = vpop.f32.mrb[5].mxu0 }
 0x22a   :  { %v863_v26 = vpack.c.bf16 %v341_v23, %v341_v23  ;;  %v940_v27 = vpop.f32.mrb[6].mxu0 }
 0x22b   :  { %427 = vst.msk [vmem:[%s1453_s6 + $0x18] sm:$0xf] %vm420_vm1, %v865_v22  ;;  %v866_v30 = vpack.c.bf16 %v940_v27, %v940_v27  ;;  %v344_v31 = vpop.f32.mrb[7].mxu0 }
 0x22c   :  { %425 = vst.msk [vmem:[%s1453_s6 + $0x10] sm:$0xf] %vm420_vm1, %v863_v26  ;;  %v864_v37 = vpack.c.bf16 %v344_v31, %v344_v31 }
 0x22d   :  { %428 = vst.msk [vmem:[%s1453_s6 + $0x1c] sm:$0xf] %vm420_vm1, %v866_v30 }
 0x22e   :  { %426 = vst.msk [vmem:[%s1453_s6 + $0x14] sm:$0xf] %vm420_vm1, %v864_v37 }
 0x230   :  { %v955_v32 = vpop.f32.mrb[4].mxu1  ;;  %v975_v33 = vpop.f32.mrb[8].mxu0 }
 0x231   :  { %v873_v34 = vpack.c.bf16 %v955_v32, %v955_v32  ;;  %v499_v46 = vpop.f32.mrb[5].mxu1  ;;  %v885_v35 = vpack.c.bf16 %v975_v33, %v975_v33  ;;  %v672_v38 = vpop.f32.mrb[9].mxu0 }
 0x232   :  { %v871_v39 = vpack.c.bf16 %v499_v46, %v499_v46  ;;  %v956_v40 = vpop.f32.mrb[6].mxu1  ;;  %v883_v41 = vpack.c.bf16 %v672_v38, %v672_v38  ;;  %v976_v42 = vpop.f32.mrb[10].mxu0 }
 0x233   :  { %596 = vst.msk [vmem:[%s1454_s7 + $0x8] sm:$0xf] %vm420_vm1, %v873_v34  ;;  %769 = vst.msk [vmem:[%s1455_s8 + $0x8] sm:$0xf] %vm420_vm1, %v885_v35  ;;  %v874_v47 = vpack.c.bf16 %v956_v40, %v956_v40  ;;  %v502_v43 = vpop.f32.mrb[7].mxu1  ;;  %v886_v56 = vpack.c.bf16 %v976_v42, %v976_v42  ;;  %v675_v44 = vpop.f32.mrb[11].mxu0 }
 0x234   :  { %594 = vst.msk [vmem:[%s1454_s7] sm:$0xf] %vm420_vm1, %v871_v39  ;;  %767 = vst.msk [vmem:[%s1455_s8] sm:$0xf] %vm420_vm1, %v883_v41  ;;  %v872_v45 = vpack.c.bf16 %v502_v43, %v502_v43  ;;  %v884_v48 = vpack.c.bf16 %v675_v44, %v675_v44 }
 0x235   :  { %597 = vst.msk [vmem:[%s1454_s7 + $0xc] sm:$0xf] %vm420_vm1, %v874_v47  ;;  %770 = vst.msk [vmem:[%s1455_s8 + $0xc] sm:$0xf] %vm420_vm1, %v886_v56 }
 0x236   :  { %595 = vst.msk [vmem:[%s1454_s7 + $0x4] sm:$0xf] %vm420_vm1, %v872_v45  ;;  %768 = vst.msk [vmem:[%s1455_s8 + $0x4] sm:$0xf] %vm420_vm1, %v884_v48 }
 0x238   :  { %v959_v57 = vpop.f32.mrb[8].mxu1  ;;  %v979_v49 = vpop.f32.mrb[12].mxu0 }
 0x239   :  { %v877_v50 = vpack.c.bf16 %v959_v57, %v959_v57  ;;  %v515_v51 = vpop.f32.mrb[9].mxu1  ;;  %v889_v52 = vpack.c.bf16 %v979_v49, %v979_v49  ;;  %v688_v2 = vpop.f32.mrb[13].mxu0 }
 0x23a   :  { %v875_v25 = vpack.c.bf16 %v515_v51, %v515_v51  ;;  %v960_v53 = vpop.f32.mrb[10].mxu1  ;;  %v887_v54 = vpack.c.bf16 %v688_v2, %v688_v2  ;;  %v980_v55 = vpop.f32.mrb[14].mxu0 }
 0x23b   :  { %600 = vst.msk [vmem:[%s1454_s7 + $0x18] sm:$0xf] %vm420_vm1, %v877_v50  ;;  %773 = vst.msk [vmem:[%s1455_s8 + $0x18] sm:$0xf] %vm420_vm1, %v889_v52  ;;  %v878_v58 = vpack.c.bf16 %v960_v53, %v960_v53  ;;  %v518_v3 = vpop.f32.mrb[11].mxu1  ;;  %v890_v59 = vpack.c.bf16 %v980_v55, %v980_v55  ;;  %v691_v60 = vpop.f32.mrb[15].mxu0 }
 0x23c   :  { %598 = vst.msk [vmem:[%s1454_s7 + $0x10] sm:$0xf] %vm420_vm1, %v875_v25  ;;  %771 = vst.msk [vmem:[%s1455_s8 + $0x10] sm:$0xf] %vm420_vm1, %v887_v54  ;;  %v876_v12 = vpack.c.bf16 %v518_v3, %v518_v3  ;;  %v888_v62 = vpack.c.bf16 %v691_v60, %v691_v60 }
 0x23d   :  { %601 = vst.msk [vmem:[%s1454_s7 + $0x1c] sm:$0xf] %vm420_vm1, %v878_v58  ;;  %774 = vst.msk [vmem:[%s1455_s8 + $0x1c] sm:$0xf] %vm420_vm1, %v890_v59 }
 0x23e   :  { %599 = vst.msk [vmem:[%s1454_s7 + $0x14] sm:$0xf] %vm420_vm1, %v876_v12  ;;  %772 = vst.msk [vmem:[%s1455_s8 + $0x14] sm:$0xf] %vm420_vm1, %v888_v62 }
 0x240   :  { %v963_v63 = vpop.f32.mrb[12].mxu1  ;;  %v983_v0 = vpop.f32.mrb[16].mxu0 }
 0x241   :  { %v881_v1 = vpack.c.bf16 %v963_v63, %v963_v63  ;;  %v531_v13 = vpop.f32.mrb[13].mxu1  ;;  %v893_v4 = vpack.c.bf16 %v983_v0, %v983_v0  ;;  %v704_v5 = vpop.f32.mrb[17].mxu0 }
 0x242   :  { %v879_v24 = vpack.c.bf16 %v531_v13, %v531_v13  ;;  %v964_v6 = vpop.f32.mrb[14].mxu1  ;;  %v891_v61 = vpack.c.bf16 %v704_v5, %v704_v5  ;;  %v984_v7 = vpop.f32.mrb[18].mxu0 }
 0x243   :  { %604 = vst.msk [vmem:[%s1454_s7 + $0x28] sm:$0xf] %vm420_vm1, %v881_v1  ;;  %777 = vst.msk [vmem:[%s1455_s8 + $0x28] sm:$0xf] %vm420_vm1, %v893_v4  ;;  %v882_v28 = vpack.c.bf16 %v964_v6, %v964_v6  ;;  %v534_v8 = vpop.f32.mrb[15].mxu1  ;;  %v894_v9 = vpack.c.bf16 %v984_v7, %v984_v7  ;;  %v707_v10 = vpop.f32.mrb[19].mxu0 }
 0x244   :  { %602 = vst.msk [vmem:[%s1454_s7 + $0x20] sm:$0xf] %vm420_vm1, %v879_v24  ;;  %775 = vst.msk [vmem:[%s1455_s8 + $0x20] sm:$0xf] %vm420_vm1, %v891_v61  ;;  %v880_v11 = vpack.c.bf16 %v534_v8, %v534_v8  ;;  %v892_v14 = vpack.c.bf16 %v707_v10, %v707_v10 }
 0x245   :  { %605 = vst.msk [vmem:[%s1454_s7 + $0x2c] sm:$0xf] %vm420_vm1, %v882_v28  ;;  %778 = vst.msk [vmem:[%s1455_s8 + $0x2c] sm:$0xf] %vm420_vm1, %v894_v9 }
 0x246   :  { %603 = vst.msk [vmem:[%s1454_s7 + $0x24] sm:$0xf] %vm420_vm1, %v880_v11  ;;  %776 = vst.msk [vmem:[%s1455_s8 + $0x24] sm:$0xf] %vm420_vm1, %v892_v14 }

</bundles_post_ra>
